<compile_context>
chip_gen: v7x
topology: tpu7x:2x2x1
jax: 0.10.0
libtpu: 0.0.40
codegen_flags: <defaults>
</compile_context>

<pallas_src>
import functools

import jax
import jax.numpy as jnp
from jax import lax
from jax.experimental import pallas as pl
from jax.experimental.pallas import tpu as pltpu

F = 2     # true state / feature dimension (Linear(2, ...), Linear(..., 2))
FP = 8    # feature dim padded to a sublane multiple (aligned, unmasked I/O)
H = 50    # true hidden width
HP = 56   # hidden width padded to a sublane multiple (trimmed from 64)


# ----------------------------------------------------------------------------
# In-kernel MLP (feature-major: y is (FP, TB), batch on the 128-wide lane axis)
# ----------------------------------------------------------------------------
def _mlp_from_refs(y, w1_ref, b1_ref, w2_ref, b2_ref, w3_ref, b3_ref, mxu_dtype):
    """y: (FP, TB) f32 with pad rows == 0. Returns dy/dt: (FP, TB) f32, pad rows == 0.

    All three layers run on the MXU (it is otherwise idle for this kernel);
    weights/biases are re-read from VMEM refs per eval to avoid pinning vregs
    across the RK4 loop.
    """
    cast = lambda a: a.astype(mxu_dtype)
    # Layer 1: (HP, FP) x (FP, TB) -> (HP, TB). Pad cols of w1 are zero.
    h1 = jnp.tanh(
        jnp.dot(cast(w1_ref[...]), cast(y), preferred_element_type=jnp.float32)
        + b1_ref[...])
    # Layer 2: (HP, HP) x (HP, TB) -> (HP, TB).
    h2 = jnp.tanh(
        jnp.dot(cast(w2_ref[...]), cast(h1), preferred_element_type=jnp.float32)
        + b2_ref[...])
    # Layer 3: (FP, HP) x (HP, TB) -> (FP, TB). Pad rows of w3/b3 are zero.
    return (jnp.dot(cast(w3_ref[...]), cast(h2), preferred_element_type=jnp.float32)
            + b3_ref[...])


def _make_forward_kernel(mxu_dtype):
    def kernel(y_ref, w1_ref, b1_ref, w2_ref, b2_ref, w3_ref, b3_ref, o_ref):
        o_ref[...] = _mlp_from_refs(
            y_ref[...], w1_ref, b1_ref, w2_ref, b2_ref, w3_ref, b3_ref, mxu_dtype)
    return kernel


def _make_rk4_kernel(n_steps, dt, mxu_dtype):
    dt = float(dt)

    def kernel(y_ref, w1_ref, b1_ref, w2_ref, b2_ref, w3_ref, b3_ref, o_ref):
        def f(y):
            return _mlp_from_refs(
                y, w1_ref, b1_ref, w2_ref, b2_ref, w3_ref, b3_ref, mxu_dtype)

        def step(_, y):
            k1 = f(y)
            k2 = f(y + (0.5 * dt) * k1)
            k3 = f(y + (0.5 * dt) * k2)
            k4 = f(y + dt * k3)
            return y + (dt / 6.0) * (k1 + 2.0 * k2 + 2.0 * k3 + k4)

        # Short fixed trip count: fully unroll for LLO scheduler visibility.
        o_ref[...] = lax.fori_loop(0, n_steps, step, y_ref[...], unroll=True)

    return kernel


# ----------------------------------------------------------------------------
# Host-side packing / planning / specs
# ----------------------------------------------------------------------------
def init_params(key):
    """PyTorch init: weights ~ Normal(0, 0.1), biases = 1.0.  PyTorch shapes (out,in)."""
    k1, k2, k3 = jax.random.split(key, 3)
    w1 = 0.1 * jax.random.normal(k1, (H, F), dtype=jnp.float32)
    b1 = jnp.ones((H,), dtype=jnp.float32)
    w2 = 0.1 * jax.random.normal(k2, (H, H), dtype=jnp.float32)
    b2 = jnp.ones((H,), dtype=jnp.float32)
    w3 = 0.1 * jax.random.normal(k3, (F, H), dtype=jnp.float32)
    b3 = jnp.ones((F,), dtype=jnp.float32)
    return (w1, b1, w2, b2, w3, b3)


def pack_params(params):
    """Zero-pad (50->56 hidden, 2->8 feature) once, outside the per-call path.

    Pad rows/cols and pad biases are 0, so padded hidden/feature rows stay
    exactly 0 through both tanh layers and the output.
    """
    w1, b1, w2, b2, w3, b3 = params
    w1p = jnp.zeros((HP, FP), jnp.float32).at[:H, :F].set(w1)
    b1p = jnp.zeros((HP, 1), jnp.float32).at[:H, 0].set(b1)
    w2p = jnp.zeros((HP, HP), jnp.float32).at[:H, :H].set(w2)
    b2p = jnp.zeros((HP, 1), jnp.float32).at[:H, 0].set(b2)
    w3p = jnp.zeros((FP, HP), jnp.float32).at[:F, :H].set(w3)
    b3p = jnp.zeros((FP, 1), jnp.float32).at[:F, 0].set(b3)
    return (w1p, b1p, w2p, b2p, w3p, b3p)


def _round_up(x, m):
    return ((x + m - 1) // m) * m


def _plan_batch(batch, max_tile):
    """Pick (tile_b, padded_batch): maximal lane-dense tiles, grid >= 2 when
    possible so the 'parallel' batch axis spans both v7x TensorCores."""
    bp = _round_up(max(batch, 1), 128)
    if bp <= 128:
        return 128, 128
    n_tiles = max(2, pl.cdiv(bp, max_tile))
    tile = _round_up(pl.cdiv(bp, n_tiles), 128)
    return tile, tile * n_tiles


def _pad_y(y, Bp):
    """(B, F) -> zero-padded feature-major (FP, Bp) f32."""
    B = y.shape[0]
    return jnp.zeros((FP, Bp), jnp.float32).at[:F, :B].set(y.T.astype(jnp.float32))


def _cost_estimate(Bp, n_grid, n_evals):
    flops_per_eval = 2 * Bp * (FP * HP + HP * HP + HP * FP)
    trans_per_eval = 2 * Bp * HP
    weight_bytes = 4 * (HP * FP + HP + HP * HP + HP + FP * HP + FP)
    io_bytes = 4 * 2 * FP * Bp
    return pl.CostEstimate(
        flops=n_evals * flops_per_eval,
        transcendentals=n_evals * trans_per_eval,
        bytes_accessed=io_bytes + n_grid * weight_bytes,
    )


def _run_kernel(kernel, y_t, packed, tile_b, Bp, n_evals):
    grid = (Bp // tile_b,)
    io_spec = pl.BlockSpec((FP, tile_b), lambda i: (0, i))
    resident = lambda shape: pl.BlockSpec(shape, lambda i: (0, 0))  # stays in VMEM
    in_specs = [
        io_spec,                 # y (feature-major)
        resident((HP, FP)),      # w1 (padded)
        resident((HP, 1)),       # b1
        resident((HP, HP)),      # w2
        resident((HP, 1)),       # b2
        resident((FP, HP)),      # w3 (padded)
        resident((FP, 1)),       # b3
    ]
    return pl.pallas_call(
        kernel,
        out_shape=jax.ShapeDtypeStruct((FP, Bp), jnp.float32),
        grid=grid,
        in_specs=in_specs,
        out_specs=io_spec,
        compiler_params=pltpu.CompilerParams(dimension_semantics=("parallel",)),
        cost_estimate=_cost_estimate(Bp, grid[0], n_evals),
    )(y_t, *packed)


# ----------------------------------------------------------------------------
# Public wrappers (jitted; weight packing done once by the caller)
# ----------------------------------------------------------------------------
@functools.partial(jax.jit, static_argnames=("max_tile", "mxu_dtype"))
def neural_ode_forward(t, y, packed_params, *, max_tile=2048, mxu_dtype=jnp.float32):
    """Pallas-backed NeuralODE.forward(t, y). `t` is unused (as in PyTorch)."""
    del t
    B = y.shape[0]
    tile_b, Bp = _plan_batch(B, max_tile)
    y_t = _pad_y(y, Bp)
    out_t = _run_kernel(_make_forward_kernel(mxu_dtype), y_t, packed_params,
                        tile_b, Bp, n_evals=1)
    return out_t[:F, :B].T  # back to (B, F)


@functools.partial(jax.jit, static_argnames=("dt", "n_steps", "max_tile", "mxu_dtype"))
def neural_ode_rk4(y0, packed_params, *, dt=0.1, n_steps=8, max_tile=2048,
                   mxu_dtype=jnp.float32):
    """Fixed-step RK4 integration of dy/dt = net(y), fully fused in one kernel."""
    B = y0.shape[0]
    tile_b, Bp = _plan_batch(B, max_tile)
    y_t = _pad_y(y0, Bp)
    out_t = _run_kernel(_make_rk4_kernel(n_steps, dt, mxu_dtype), y_t, packed_params,
                        tile_b, Bp, n_evals=4 * n_steps)
    return out_t[:F, :B].T


# ----------------------------------------------------------------------------
# Pure-JAX references
# ----------------------------------------------------------------------------
def reference_forward(y, params):
    w1, b1, w2, b2, w3, b3 = params
    h1 = jnp.tanh(y @ w1.T + b1)
    h2 = jnp.tanh(h1 @ w2.T + b2)
    return h2 @ w3.T + b3


def reference_rk4(y0, params, dt, n_steps):
    def f(y):
        return reference_forward(y, params)

    def step(y, _):
        k1 = f(y)
        k2 = f(y + 0.5 * dt * k1)
        k3 = f(y + 0.5 * dt * k2)
        k4 = f(y + dt * k3)
        return y + (dt / 6.0) * (k1 + 2.0 * k2 + 2.0 * k3 + k4), None

    y, _ = lax.scan(step, y0, None, length=n_steps)
    return y


# ----------------------------------------------------------------------------
if __name__ == "__main__":
    key = jax.random.PRNGKey(0)
    kp, ky = jax.random.split(key)
    params = init_params(kp)
    packed = pack_params(params)  # packed once, outside the per-call path

    B = 256  # two 128-wide lane tiles -> grid of 2 ("parallel" spans both v7x TCs)
    y = jax.random.normal(ky, (B, F), dtype=jnp.float32)
    t = jnp.float32(0.0)  # unused, kept for API parity with forward(t, y)

    # Single forward evaluation (the module's forward pass).
    out = jax.block_until_ready(neural_ode_forward(t, y, packed))
    ref = reference_forward(y, params)
    assert out.shape == (B, F)
    assert jnp.allclose(out, ref, atol=1e-4, rtol=1e-4), "forward mismatch vs reference"

    # Fused fixed-step RK4 trajectory (solver loop inside one pallas_call).
    dt, n_steps = 0.1, 8
    y_T = jax.block_until_ready(neural_ode_rk4(y, packed, dt=dt, n_steps=n_steps))
    y_T_ref = reference_rk4(y, params, dt, n_steps)
    assert y_T.shape == (B, F)
    assert jnp.allclose(y_T, y_T_ref, atol=1e-3, rtol=1e-3), "RK4 mismatch vs reference"

    print("KERNEL_OK")
</pallas_src>

<mosaic_0001>
module attributes {stable_mosaic.version = 11 : i64} {
  func.func @kernel(%arg0: i32, %arg1: memref<8x128xf32, #tpu.memory_space<vmem>>, %arg2: memref<56x8xf32, #tpu.memory_space<vmem>>, %arg3: memref<56x1xf32, #tpu.memory_space<vmem>>, %arg4: memref<56x56xf32, #tpu.memory_space<vmem>>, %arg5: memref<56x1xf32, #tpu.memory_space<vmem>>, %arg6: memref<8x56xf32, #tpu.memory_space<vmem>>, %arg7: memref<8x1xf32, #tpu.memory_space<vmem>>, %arg8: memref<8x128xf32, #tpu.memory_space<vmem>>) attributes {dimension_semantics = [#tpu.dimension_semantics<parallel>], iteration_bounds = array<i64: 2>, scalar_prefetch = 0 : i64, scratch_operands = 0 : i64, tpu.core_type = #tpu.core_type<tc>, window_params = [{transform_indices = @transform_0, window_bounds = array<i64: 8, 128>}, {pipeline_mode = #tpu.pipeline_mode<synchronous>, transform_indices = @transform_1, window_bounds = array<i64: 56, 8>}, {pipeline_mode = #tpu.pipeline_mode<synchronous>, transform_indices = @transform_2, window_bounds = array<i64: 56, 1>}, {pipeline_mode = #tpu.pipeline_mode<synchronous>, transform_indices = @transform_3, window_bounds = array<i64: 56, 56>}, {pipeline_mode = #tpu.pipeline_mode<synchronous>, transform_indices = @transform_4, window_bounds = array<i64: 56, 1>}, {pipeline_mode = #tpu.pipeline_mode<synchronous>, transform_indices = @transform_5, window_bounds = array<i64: 8, 56>}, {pipeline_mode = #tpu.pipeline_mode<synchronous>, transform_indices = @transform_6, window_bounds = array<i64: 8, 1>}, {transform_indices = @transform_7, window_bounds = array<i64: 8, 128>}]} {
    %c0 = arith.constant 0 : index
    %c0_0 = arith.constant 0 : index
    %0 = vector.load %arg1[%c0, %c0_0] : memref<8x128xf32, #tpu.memory_space<vmem>>, vector<8x128xf32>
    %c0_1 = arith.constant 0 : index
    %c0_2 = arith.constant 0 : index
    %1 = vector.load %arg2[%c0_1, %c0_2] : memref<56x8xf32, #tpu.memory_space<vmem>>, vector<56x8xf32>
    %cst = arith.constant dense<0.000000e+00> : vector<56x128xf32>
    %2 = tpu.matmul %1, %0, %cst {dimension_numbers = #tpu.dot_dimension_numbers<[1], [0], [0], [1], [0, 0, 1, 1], [], []>} : vector<56x8xf32>, vector<8x128xf32>, vector<56x128xf32> -> vector<56x128xf32>
    %c0_3 = arith.constant 0 : index
    %c0_4 = arith.constant 0 : index
    %3 = vector.load %arg3[%c0_3, %c0_4] : memref<56x1xf32, #tpu.memory_space<vmem>>, vector<56x1xf32>
    %4 = vector.broadcast %3 : vector<56x1xf32> to vector<56x128xf32>
    %5 = arith.addf %2, %4 : vector<56x128xf32>
    %6 = math.tanh %5 : vector<56x128xf32>
    %c0_5 = arith.constant 0 : index
    %c0_6 = arith.constant 0 : index
    %7 = vector.load %arg4[%c0_5, %c0_6] : memref<56x56xf32, #tpu.memory_space<vmem>>, vector<56x56xf32>
    %cst_7 = arith.constant dense<0.000000e+00> : vector<56x128xf32>
    %8 = tpu.matmul %7, %6, %cst_7 {dimension_numbers = #tpu.dot_dimension_numbers<[1], [0], [0], [1], [0, 0, 1, 1], [], []>} : vector<56x56xf32>, vector<56x128xf32>, vector<56x128xf32> -> vector<56x128xf32>
    %c0_8 = arith.constant 0 : index
    %c0_9 = arith.constant 0 : index
    %9 = vector.load %arg5[%c0_8, %c0_9] : memref<56x1xf32, #tpu.memory_space<vmem>>, vector<56x1xf32>
    %10 = vector.broadcast %9 : vector<56x1xf32> to vector<56x128xf32>
    %11 = arith.addf %8, %10 : vector<56x128xf32>
    %12 = math.tanh %11 : vector<56x128xf32>
    %c0_10 = arith.constant 0 : index
    %c0_11 = arith.constant 0 : index
    %13 = vector.load %arg6[%c0_10, %c0_11] : memref<8x56xf32, #tpu.memory_space<vmem>>, vector<8x56xf32>
    %cst_12 = arith.constant dense<0.000000e+00> : vector<8x128xf32>
    %14 = tpu.matmul %13, %12, %cst_12 {dimension_numbers = #tpu.dot_dimension_numbers<[1], [0], [0], [1], [0, 0, 1, 1], [], []>} : vector<8x56xf32>, vector<56x128xf32>, vector<8x128xf32> -> vector<8x128xf32>
    %c0_13 = arith.constant 0 : index
    %c0_14 = arith.constant 0 : index
    %15 = vector.load %arg7[%c0_13, %c0_14] : memref<8x1xf32, #tpu.memory_space<vmem>>, vector<8x1xf32>
    %16 = vector.broadcast %15 : vector<8x1xf32> to vector<8x128xf32>
    %17 = arith.addf %14, %16 : vector<8x128xf32>
    %c0_15 = arith.constant 0 : index
    %c0_16 = arith.constant 0 : index
    %18 = vector.load %arg8[%c0_15, %c0_16] : memref<8x128xf32, #tpu.memory_space<vmem>>, vector<8x128xf32>
    tpu.vector_store %arg8[%c0_15, %c0_16], %17 {strides = array<i32>} : memref<8x128xf32, #tpu.memory_space<vmem>>, vector<8x128xf32>,
    return
  }
  func.func @transform_0(%arg0: i32) -> (i32, i32) {
    %c0_i32 = arith.constant 0 : i32
    %c0_i32_0 = arith.constant 0 : i32
    return %c0_i32, %arg0 : i32, i32
  }
  func.func @transform_1(%arg0: i32) -> (i32, i32) {
    %c0_i32 = arith.constant 0 : i32
    %c0_i32_0 = arith.constant 0 : i32
    %c0_i32_1 = arith.constant 0 : i32
    return %c0_i32, %c0_i32_0 : i32, i32
  }
  func.func @transform_2(%arg0: i32) -> (i32, i32) {
    %c0_i32 = arith.constant 0 : i32
    %c0_i32_0 = arith.constant 0 : i32
    %c0_i32_1 = arith.constant 0 : i32
    return %c0_i32, %c0_i32_0 : i32, i32
  }
  func.func @transform_3(%arg0: i32) -> (i32, i32) {
    %c0_i32 = arith.constant 0 : i32
    %c0_i32_0 = arith.constant 0 : i32
    %c0_i32_1 = arith.constant 0 : i32
    return %c0_i32, %c0_i32_0 : i32, i32
  }
  func.func @transform_4(%arg0: i32) -> (i32, i32) {
    %c0_i32 = arith.constant 0 : i32
    %c0_i32_0 = arith.constant 0 : i32
    %c0_i32_1 = arith.constant 0 : i32
    return %c0_i32, %c0_i32_0 : i32, i32
  }
  func.func @transform_5(%arg0: i32) -> (i32, i32) {
    %c0_i32 = arith.constant 0 : i32
    %c0_i32_0 = arith.constant 0 : i32
    %c0_i32_1 = arith.constant 0 : i32
    return %c0_i32, %c0_i32_0 : i32, i32
  }
  func.func @transform_6(%arg0: i32) -> (i32, i32) {
    %c0_i32 = arith.constant 0 : i32
    %c0_i32_0 = arith.constant 0 : i32
    %c0_i32_1 = arith.constant 0 : i32
    return %c0_i32, %c0_i32_0 : i32, i32
  }
  func.func @transform_7(%arg0: i32) -> (i32, i32) {
    %c0_i32 = arith.constant 0 : i32
    %c0_i32_0 = arith.constant 0 : i32
    return %c0_i32, %arg0 : i32, i32
  }
}

</mosaic_0001>

<bundles_post_ra>
// kernel: neural_ode_forward.1
= control target key start
LH: loop header
LB: loop body
LE: loop exit
PB: predicated region body
PF: predicated region fallthrough
CT: control target
= control target key end

     0   :  { %s1006_s24 = smov 0   ;;  %s1174_s0 = inlined_call_operand.vmem [shape: f32[8,256], index: 0, kind: input, shape index: {}]   ;;  %s1175_s1 = inlined_call_operand.vmem [shape: f32[56,8], index: 1, kind: input, shape index: {}]   ;;  %s1176_s2 = inlined_call_operand.vmem [shape: f32[56,1], index: 2, kind: input, shape index: {}]   ;;  %s1177_s3 = inlined_call_operand.vmem [shape: f32[56,56], index: 3, kind: input, shape index: {}]   ;;  %s1178_s4 = inlined_call_operand.vmem [shape: f32[56,1], index: 4, kind: input, shape index: {}]   ;;  %s1179_s5 = inlined_call_operand.vmem [shape: f32[8,56], index: 5, kind: input, shape index: {}]   ;;  %s1180_s6 = inlined_call_operand.vmem [shape: f32[8,1], index: 6, kind: input, shape index: {}]   ;;  %s1181_s7 = inlined_call_operand.vmem [shape: f32[8,256], index: 7, kind: output, shape index: {}]  }
   0x1 LB: > { %s765_s25 = sadd.s32 4294967295, %s960_s24   ;;  %p769_p0 = scmp.ge.s32.totalorder %s960_s24, 1  ;;  %s960_s24 = sphi %s1006_s24, %s17_s24  }
   0x2   : > { %p236_p1 = scmp.lt.s32.totalorder %s960_s24, 3 }
   0x4   : > { %p237_p2 = pnand %p769_p0, %p236_p1 }
   0x5   : > { %p266_p3 = scmp.lt.s32.totalorder (!%p237_p2), %s765_s25, 1  ;;  %v962_v0 = vmov (!%p237_p2), 0.0   ;;  %vm963_vm0 = vmmov (!%p237_p2), 0   ;;  %v964_v1 = vmov (!%p237_p2), 0   ;;  %v282_v2 = vld [vmem:[%s1176_s2] sm:$0xff] (!%p237_p2)  ;;  %v284_v3 = vld [vmem:[%s1176_s2 + $0x10] sm:$0xff] (!%p237_p2) }
   0x6   : > { %240 = sbr.rel (%p237_p2) target bundleno = 737 (0x2e1), region = 48  ;;  %819 = vmatprep.subr.mxu0 (!%p237_p2), %v962_v0  ;;  %821 = vmatprep.mubr.msk.f32.mxu0 (!%p237_p2), %vm963_vm0, %v962_v0  ;;  %v283_v4 = vld [vmem:[%s1176_s2 + $0x8] sm:$0xff] (!%p237_p2)  ;;  %v275_v5 = vld [vmem:[%s1175_s1] sm:$0xff] (!%p237_p2)  ;;  %vm324_vm1 = vcmask (!%p237_p2), 64512   ;;  %v285_v6 = vld [vmem:[%s1176_s2 + $0x18] sm:$0xff] (!%p237_p2)  ;;  %v965_v25 = vmov (!%p237_p2), 0.0|0.0  }
   0x7   : > { %924 = vset.pattern.permute.xlu0 (!%p237_p2), %v964_v1  ;;  %925 = vset.pattern.permute.xlu1 (!%p237_p2), %v964_v1  ;;  %v286_v8 = vld [vmem:[%s1176_s2 + $0x20] sm:$0xff] (!%p237_p2)  ;;  %v276_v9 = vld [vmem:[%s1175_s1 + $0x8] sm:$0xff] (!%p237_p2)  ;;  %v288_v11 = vld [vmem:[%s1176_s2 + $0x30] sm:$0xff] (!%p237_p2)  ;;  %vm502_vm2 = vcmask (!%p237_p2), 457728  }
   0x8   : > { %291 = vperm.xlu0 (!%p237_p2), %924, %v282_v2   ;;  %856 = vmatprep.mubr.msk.f32.mxu1 (!%p237_p2), %vm963_vm0, %v962_v0  ;;  %v287_v10 = vld [vmem:[%s1176_s2 + $0x28] sm:$0xff] (!%p237_p2)  ;;  %v277_v12 = vld [vmem:[%s1175_s1 + $0x10] sm:$0xff] (!%p237_p2)  ;;  %v460_v13 = vld [vmem:[%s1178_s4] sm:$0xff] (!%p237_p2) }
   0x9   : > { %301 = vperm.xlu1 (!%p237_p2), %925, %v284_v3   ;;  %v461_v14 = vld [vmem:[%s1178_s4 + $0x8] sm:$0xff] (!%p237_p2)  ;;  %v278_v15 = vld [vmem:[%s1175_s1 + $0x18] sm:$0xff] (!%p237_p2)  ;;  %v462_v16 = vld [vmem:[%s1178_s4 + $0x10] sm:$0xff] (!%p237_p2)  ;;  %894 = vmatprep.subr.bf16.mxu1 (!%p237_p2), %v965_v25 }
   0xa   : > { %v463_v17 = vld [vmem:[%s1178_s4 + $0x18] sm:$0xff] (!%p237_p2)  ;;  %v279_v18 = vld [vmem:[%s1175_s1 + $0x20] sm:$0xff] (!%p237_p2)  ;;  %v465_v20 = vld [vmem:[%s1178_s4 + $0x28] sm:$0xff] (!%p237_p2) }
   0xb   : > { %v464_v19 = vld [vmem:[%s1178_s4 + $0x20] sm:$0xff] (!%p237_p2)  ;;  %v280_v21 = vld [vmem:[%s1175_s1 + $0x28] sm:$0xff] (!%p237_p2)  ;;  %v466_v22 = vld [vmem:[%s1178_s4 + $0x30] sm:$0xff] (!%p237_p2) }
   0xc   : > { %296 = vperm.xlu0 (!%p237_p2), %924, %v283_v4   ;;  %v632_v23 = vld [vmem:[%s1180_s6] sm:$0xff] (!%p237_p2)  ;;  %v281_v24 = vld [vmem:[%s1175_s1 + $0x30] sm:$0xff] (!%p237_p2)  ;;  %v454_v2 = vld [vmem:[%s1177_s3 + $0x8] sm:$0xff] (!%p237_p2) }
   0xd   : > { %s1183_s25 = smov (!%p266_p3, %s765_s25), 1  ;;  %306 = vperm.xlu1 %925, %v285_v6   ;;  %v453_v63 = vld [vmem:[%s1177_s3] sm:$0xff]  ;;  %v455_v3 = vld [vmem:[%s1177_s3 + $0x10] sm:$0xff]  ;;  %v456_v4 = vld [vmem:[%s1177_s3 + $0x18] sm:$0xff] }
   0xe   : > { %s770_s30 = sshll.u32 %s1183_s25, 3  ;;  %v458_v6 = vld [vmem:[%s1177_s3 + $0x28] sm:$0xff] }
   0xf   : > { %s269_s12 = scalar_lea.vmem %s1174_s0, %s770_s30  ;;  %s273_s9 = scalar_lea.vmem %s1181_s7, %s770_s30 }
  0x10   : > { %v274_v7 = vld [vmem:[%s269_s12] sm:$0xff]  ;;  %311 = vperm.xlu0 %924, %v286_v8  }
  0x11   : > { %820 = vmatpush3.msra.mxu0 %v274_v7  ;;  %316 = vperm.xlu1 %925, %v287_v10   ;;  %v459_v7 = vld [vmem:[%s1177_s3 + $0x30] sm:$0xff] }
  0x12   : > { %822 = vmatmul.mubr.msk.f32.vlgmr.msra.gmra.mrb[0].mxu0 %vm324_vm1, %v275_v5  ;;  %903 = vmatprep.subr.bf16.mxu0 %v965_v25  ;;  %v457_v5 = vld [vmem:[%s1177_s3 + $0x20] sm:$0xff] }
  0x13   : > { %824 = vmatprep.mubr.msk.f32.mxu0 %vm963_vm0, %v962_v0 }
  0x14   : > { %321 = vperm.xlu0 %924, %v288_v11  }
  0x15   : > { %469 = vperm.xlu1 %925, %v460_v13  }
  0x16   : > { %825 = vmatmul.mubr.msk.f32.gmra.mrb[2].mxu0 %vm324_vm1, %v276_v9 }
  0x17   : > { %827 = vmatprep.mubr.msk.f32.mxu0 %vm963_vm0, %v962_v0 }
  0x18   : > { %474 = vperm.xlu0 %924, %v461_v14  }
  0x19   : > { %479 = vperm.xlu1 %925, %v462_v16  }
  0x1a   : > { %828 = vmatmul.mubr.msk.f32.gmra.mrb[4].mxu0 %vm324_vm1, %v277_v12 }
  0x1b   : > { %830 = vmatprep.mubr.msk.f32.mxu0 %vm963_vm0, %v962_v0 }
  0x1c   : > { %484 = vperm.xlu0 %924, %v463_v17  }
  0x1d   : > { %489 = vperm.xlu1 %925, %v464_v19  }
  0x1e   : > { %831 = vmatmul.mubr.msk.f32.gmra.mrb[6].mxu0 %vm324_vm1, %v278_v15 }
  0x1f   : > { %833 = vmatprep.mubr.msk.f32.mxu0 %vm963_vm0, %v962_v0 }
  0x20   : > { %494 = vperm.xlu0 %924, %v465_v20  }
  0x21   : > { %499 = vperm.xlu1 %925, %v466_v22  }
  0x22   : > { %834 = vmatmul.mubr.msk.f32.gmra.mrb[8].mxu0 %vm324_vm1, %v279_v18 }
  0x23   : > { %836 = vmatprep.mubr.msk.f32.mxu0 %vm963_vm0, %v962_v0 }
  0x24   : > { %635 = vperm.xlu0 %924, %v632_v23  }
  0x26   : > { %837 = vmatmul.mubr.msk.f32.gmra.mrb[10].mxu0 %vm324_vm1, %v280_v21 }
  0x27   : > { %839 = vmatprep.mubr.msk.f32.mxu0 %vm963_vm0, %v962_v0 }
  0x2a   : > { %840 = vmatmul.mubr.msk.f32.gmra.mrb[12].mxu0 %vm324_vm1, %v281_v24 }
  0x2b   : > { %891 = vmatprep.mubr.msk.f32.mxu0 %vm963_vm0, %v962_v0 }
  0x87   : > { %v292_v26 = vpop.permute.xlu0 %291 }
  0x88   : > { %v302_v34 = vpop.permute.xlu1 %301 }
  0x8b   : > { %v297_v30 = vpop.permute.xlu0 %296 }
  0x8c   : > { %v307_v38 = vpop.permute.xlu1 %306 }
  0x8f   : > { %v312_v45 = vpop.permute.xlu0 %311 }
  0x90   : > { %v317_v49 = vpop.permute.xlu1 %316 }
  0x93   : > { %v322_v54 = vpop.permute.xlu0 %321 }
  0x94   : > { %v470_v9 = vpop.permute.xlu1 %469 }
  0x97   : > { %v475_v12 = vpop.permute.xlu0 %474 }
  0x98   : > { %v480_v17 = vpop.permute.xlu1 %479 }
  0x9b   : > { %v485_v20 = vpop.permute.xlu0 %484 }
  0xe5   : > { %v412_v27 = vpop.f32.mrb[0].mxu0 }
  0xe6   : > { %v823_v28 = vpop.f32.mrb[1].mxu0  ;;  %v413_v29 = vadd.f32 %v412_v27, %v292_v26 }
  0xe7   : > { %v490_v28 = vpop.permute.xlu1 %489 }
  0xe8   : > { %926 = vtanh.f32 %v413_v29 }
  0xe9   : > { %v417_v31 = vpop.f32.mrb[2].mxu0 }
  0xea   : > { %v418_v32 = vadd.f32 %v417_v31, %v297_v30  ;;  %v826_v33 = vpop.f32.mrb[3].mxu0 }
  0xec   : > { %928 = vtanh.f32 %v418_v32  ;;  %v495_v32 = vpop.permute.xlu0 %494 }
  0xed   : > { %v422_v35 = vpop.f32.mrb[4].mxu0 }
  0xee   : > { %v829_v36 = vpop.f32.mrb[5].mxu0  ;;  %v423_v37 = vadd.f32 %v422_v35, %v302_v34 }
  0xf0   : > { %930 = vtanh.f32 %v423_v37  ;;  %v500_v37 = vpop.permute.xlu1 %499 }
  0xf1   : > { %v427_v39 = vpop.f32.mrb[6].mxu0 }
  0xf2   : > { %v428_v40 = vadd.f32 %v427_v39, %v307_v38  ;;  %v832_v41 = vpop.f32.mrb[7].mxu0  ;;  %v927_v42 = vpop.eup %926 }
  0xf4   : > { %932 = vtanh.f32 %v428_v40 }
  0xf5   : > { %v432_v43 = vpop.f32.mrb[8].mxu0 }
  0xf6   : > { %v929_v44 = vpop.eup %928  ;;  %v835_v46 = vpop.f32.mrb[9].mxu0  ;;  %v433_v47 = vadd.f32 %v432_v43, %v312_v45 }
  0xf7   : > { %v895_v48 = vpack.c.bf16 %v929_v44, %v927_v42  ;;  %v631_v46 = vld [vmem:[%s1179_s5] sm:$0xff] }
  0xf8   : > { %934 = vtanh.f32 %v433_v47 }
  0xf9   : > { %v437_v50 = vpop.f32.mrb[10].mxu0  ;;  %896 = vmatpush3.bf16.msra.mxu1 %v895_v48 }
  0xfa   : > { %v438_v51 = vadd.f32 %v437_v50, %v317_v49  ;;  %v838_v52 = vpop.f32.mrb[11].mxu0  ;;  %897 = vmatprep.subr.bf16.mxu1 %v965_v25  ;;  %v931_v53 = vpop.eup %930 }
  0xfc   : > { %936 = vtanh.f32 %v438_v51 }
  0xfd   : > { %v442_v55 = vpop.f32.mrb[12].mxu0 }
  0xfe   : > { %v933_v56 = vpop.eup %932  ;;  %v443_v57 = vadd.f32 %v442_v55, %v322_v54  ;;  %v841_v58 = vpop.f32.mrb[13].mxu0 }
  0xff   : > { %v898_v59 = vpack.c.bf16 %v933_v56, %v931_v53 }
 0x100   : > { %938 = vtanh.f32 %v443_v57 }
 0x101   : > { %899 = vmatpush3.bf16.msra.mxu1 %v898_v59 }
 0x102   : > { %900 = vmatprep.subr.bf16.mxu1 %v965_v25  ;;  %v935_v60 = vpop.eup %934 }
 0x106   : > { %v937_v61 = vpop.eup %936 }
 0x107   : > { %v901_v62 = vpack.c.bf16 %v937_v61, %v935_v60 }
 0x109   : > { %902 = vmatpush3.bf16.msra.mxu1 %v901_v62 }
 0x10a   : > { %854 = vmatprep.subr.mxu1 %v962_v0  ;;  %v939_v1 = vpop.eup %938 }
 0x10d   : > { %855 = vmatpush3.msra.mxu1 %v939_v1 }
 0x10e   : > { %857 = vmatmul.mubr.msk.f32.vlgmr.msra.gmra.mrb[0].mxu1 %vm502_vm2, %v453_v63 }
 0x10f   : > { %859 = vmatprep.mubr.msk.f32.mxu1 %vm963_vm0, %v962_v0 }
 0x112   : > { %860 = vmatmul.mubr.msk.f32.gmra.mrb[2].mxu1 %vm502_vm2, %v454_v2 }
 0x113   : > { %862 = vmatprep.mubr.msk.f32.mxu1 %vm963_vm0, %v962_v0 }
 0x116   : > { %863 = vmatmul.mubr.msk.f32.gmra.mrb[4].mxu1 %vm502_vm2, %v455_v3 }
 0x117   : > { %865 = vmatprep.mubr.msk.f32.mxu1 %vm963_vm0, %v962_v0 }
 0x11a   : > { %866 = vmatmul.mubr.msk.f32.gmra.mrb[6].mxu1 %vm502_vm2, %v456_v4 }
 0x11b   : > { %868 = vmatprep.mubr.msk.f32.mxu1 %vm963_vm0, %v962_v0 }
 0x11e   : > { %869 = vmatmul.mubr.msk.f32.gmra.mrb[8].mxu1 %vm502_vm2, %v457_v5 }
 0x11f   : > { %871 = vmatprep.mubr.msk.f32.mxu1 %vm963_vm0, %v962_v0 }
 0x122   : > { %872 = vmatmul.mubr.msk.f32.gmra.mrb[10].mxu1 %vm502_vm2, %v458_v6 }
 0x123   : > { %874 = vmatprep.mubr.msk.f32.mxu1 %vm963_vm0, %v962_v0 }
 0x126   : > { %875 = vmatmul.mubr.msk.f32.gmra.mrb[12].mxu1 %vm502_vm2, %v459_v7 }
 0x1e1   : > { %v590_v8 = vpop.f32.mrb[0].mxu1 }
 0x1e2   : > { %v858_v10 = vpop.f32.mrb[1].mxu1  ;;  %v591_v11 = vadd.f32 %v590_v8, %v470_v9 }
 0x1e4   : > { %940 = vtanh.f32 %v591_v11 }
 0x1e5   : > { %v595_v13 = vpop.f32.mrb[2].mxu1 }
 0x1e6   : > { %v596_v14 = vadd.f32 %v595_v13, %v475_v12  ;;  %v861_v15 = vpop.f32.mrb[3].mxu1 }
 0x1e8   : > { %942 = vtanh.f32 %v596_v14 }
 0x1e9   : > { %v600_v16 = vpop.f32.mrb[4].mxu1 }
 0x1ea   : > { %v864_v18 = vpop.f32.mrb[5].mxu1  ;;  %v601_v19 = vadd.f32 %v600_v16, %v480_v17 }
 0x1ec   : > { %944 = vtanh.f32 %v601_v19 }
 0x1ed   : > { %v605_v21 = vpop.f32.mrb[6].mxu1 }
 0x1ee   : > { %v606_v22 = vadd.f32 %v605_v21, %v485_v20  ;;  %v867_v23 = vpop.f32.mrb[7].mxu1  ;;  %v941_v24 = vpop.eup %940 }
 0x1f0   : > { %946 = vtanh.f32 %v606_v22 }
 0x1f1   : > { %v610_v26 = vpop.f32.mrb[8].mxu1 }
 0x1f2   : > { %v943_v27 = vpop.eup %942  ;;  %v870_v29 = vpop.f32.mrb[9].mxu1  ;;  %v611_v30 = vadd.f32 %v610_v26, %v490_v28 }
 0x1f3   : > { %v904_v31 = vpack.c.bf16 %v943_v27, %v941_v24 }
 0x1f4   : > { %948 = vtanh.f32 %v611_v30 }
 0x1f5   : > { %v615_v33 = vpop.f32.mrb[10].mxu1  ;;  %905 = vmatpush3.bf16.msra.mxu0 %v904_v31 }
 0x1f6   : > { %v616_v34 = vadd.f32 %v615_v33, %v495_v32  ;;  %v873_v35 = vpop.f32.mrb[11].mxu1  ;;  %906 = vmatprep.subr.bf16.mxu0 %v965_v25  ;;  %v945_v36 = vpop.eup %944 }
 0x1f8   : > { %950 = vtanh.f32 %v616_v34 }
 0x1f9   : > { %v620_v38 = vpop.f32.mrb[12].mxu1 }
 0x1fa   : > { %v947_v39 = vpop.eup %946  ;;  %v621_v40 = vadd.f32 %v620_v38, %v500_v37  ;;  %v876_v41 = vpop.f32.mrb[13].mxu1 }
 0x1fb   : > { %v907_v42 = vpack.c.bf16 %v947_v39, %v945_v36 }
 0x1fc   : > { %952 = vtanh.f32 %v621_v40 }
 0x1fd   : > { %908 = vmatpush3.bf16.msra.mxu0 %v907_v42 }
 0x1fe   : > { %909 = vmatprep.subr.bf16.mxu0 %v965_v25  ;;  %v949_v43 = vpop.eup %948  ;;  %v636_v25 = vpop.permute.xlu0 %635 }
 0x202   : > { %v951_v44 = vpop.eup %950 }
 0x203   : > { %v910_v45 = vpack.c.bf16 %v951_v44, %v949_v43 }
 0x205   : > { %911 = vmatpush3.bf16.msra.mxu0 %v910_v45 }
 0x206   : > { %889 = vmatprep.subr.mxu0 %v962_v0  ;;  %v953_v47 = vpop.eup %952 }
 0x209   : > { %890 = vmatpush3.msra.mxu0 %v953_v47 }
 0x20a   : > { %892 = vmatmul.mubr.msk.f32.vlgmr.msra.gmra.mrb[14].mxu0 %vm502_vm2, %v631_v46 }
 0x2dd   : > { %v707_v48 = vpop.f32.mrb[14].mxu0 }
 0x2de   : > { %v708_v49 = vadd.f32 %v707_v48, %v636_v25  ;;  %v893_v50 = vpop.f32.mrb[15].mxu0 }
 0x2e0   : > { %711 = vst [vmem:[%s273_s9] sm:$0xff] %v708_v49 }
 0x2e1 PF: > { %s17_s24 = sadd.s32 1, %s960_s24  }
 0x2e2   : > { %p14_p4 = scmp.ge.s32.totalorder %s17_s24, 4  }
 0x2e4   :  { %16 = sbr.rel (!%p14_p4) target bundleno = 1 (0x1), region = 78 }

</bundles_post_ra>
